<compile_context>
chip_gen: v6e
topology: v6e:2x2x1
jax: 0.10.0
libtpu: 0.0.40
codegen_flags: <defaults>
</compile_context>

<pallas_src>
import functools

import jax
import jax.numpy as jnp
from jax import lax
from jax.experimental import pallas as pl
from jax.experimental.pallas import tpu as pltpu


_CONTRACT_IN_DIM = (((1,), (1,)), ((), ()))  # (S, C) x (OUT, C) -> (S, OUT)


# ---------------------------------------------------------------------------
# Fused projections + flash cross-attention kernel
# ---------------------------------------------------------------------------

def _fused_cross_attention_kernel(x_ref, ctx_ref, wq_ref, wk_ref, wv_ref, o_ref,
                                  q_scr, m_scr, l_scr, acc_scr,
                                  *, heads, dim_head, scale):
    """Grid = (batch, q_tiles, kv_tiles); kv axis is the (arbitrary) reduction axis.

    x_ref:   (1, tq, Cq)      query slab for this (batch, q-tile)
    ctx_ref: (1, tkv, Cc)     context slab for this kv step
    wq_ref:  (H*D, Cq)        resident (index_map constant)
    wk_ref / wv_ref: (H*D, Cc) resident
    o_ref:   (1, tq, H*D)     final output slab (written once, at the last kv step)
    q_scr:   (H, tq, D) bf16  scaled, head-split Q (computed once per q-tile)
    m_scr / l_scr: (H, tq, 1) f32 running max / denominator
    acc_scr: (H, tq, D) f32   running numerator
    """
    ki = pl.program_id(2)
    nk = pl.num_programs(2)

    # ---- once per (batch, q-tile): project Q (bf16 MXU, f32 acc), init softmax state
    @pl.when(ki == 0)
    def _init():
        x = x_ref[0].astype(jnp.bfloat16)
        wq = wq_ref[...].astype(jnp.bfloat16)
        q = lax.dot_general(x, wq, _CONTRACT_IN_DIM,
                            preferred_element_type=jnp.float32) * scale  # f32 scale
        tq = q.shape[0]
        # head split once per q-tile: (tq, H*D) -> (H, tq, D)
        q_scr[...] = jnp.transpose(q.reshape(tq, heads, dim_head),
                                   (1, 0, 2)).astype(jnp.bfloat16)
        m_scr[...] = jnp.full_like(m_scr, -jnp.inf)
        l_scr[...] = jnp.zeros_like(l_scr)
        acc_scr[...] = jnp.zeros_like(acc_scr)

    # ---- K/V projection for this context tile (full inner width on the MXU) ----
    ctx = ctx_ref[0].astype(jnp.bfloat16)
    wk = wk_ref[...].astype(jnp.bfloat16)
    wv = wv_ref[...].astype(jnp.bfloat16)
    k = lax.dot_general(ctx, wk, _CONTRACT_IN_DIM, preferred_element_type=jnp.float32)
    v = lax.dot_general(ctx, wv, _CONTRACT_IN_DIM, preferred_element_type=jnp.float32)
    tkv = k.shape[0]
    kh = jnp.transpose(k.reshape(tkv, heads, dim_head), (1, 0, 2)).astype(jnp.bfloat16)
    vh = jnp.transpose(v.reshape(tkv, heads, dim_head), (1, 0, 2)).astype(jnp.bfloat16)

    # ---- online softmax update over this kv tile (softmax math stays in f32) ----
    q = q_scr[...]
    sim = jnp.einsum('hnd,hmd->hnm', q, kh,
                     preferred_element_type=jnp.float32)           # (H, tq, tkv) f32
    m_prev = m_scr[...]
    m_new = jnp.maximum(m_prev, jnp.max(sim, axis=-1, keepdims=True))
    alpha = jnp.exp(m_prev - m_new)
    p = jnp.exp(sim - m_new)
    l_scr[...] = alpha * l_scr[...] + jnp.sum(p, axis=-1, keepdims=True)
    acc_scr[...] = alpha * acc_scr[...] + jnp.einsum(
        'hnm,hmd->hnd', p.astype(jnp.bfloat16), vh,
        preferred_element_type=jnp.float32)
    m_scr[...] = m_new

    # ---- once per (batch, q-tile): normalize and write lane-dense 'b n (h d)' ----
    @pl.when(ki == nk - 1)
    def _finalize():
        out = acc_scr[...] * pl.reciprocal(l_scr[...], approx=True)  # (H, tq, D)
        tq = out.shape[1]
        o_ref[0] = jnp.transpose(out, (1, 0, 2)).reshape(
            tq, heads * dim_head).astype(o_ref.dtype)


def _pick_tile(size, cap):
    """Largest tile <= cap that is a multiple of 8 and divides `size`; else full."""
    if size <= cap:
        return size
    for t in range(cap - (cap % 8), 7, -8):
        if size % t == 0:
            return t
    return size


def cross_attention_forward(x, context, w_q, w_k, w_v, *, heads, dim_head, scale,
                            q_tile_cap=256, kv_tile_cap=512):
    """x: (B, N, Cq), context: (B, M, Cc), weights in PyTorch (out, in) layout.

    Returns (B, N, heads*dim_head), matching `rearrange(out, '(b h) n d -> b n (h d)')`.
    """
    b, n, cq = x.shape
    _, m, cc = context.shape
    inner = heads * dim_head
    assert w_q.shape == (inner, cq)
    assert w_k.shape == (inner, cc) and w_v.shape == (inner, cc)

    tq = _pick_tile(n, q_tile_cap)
    tkv = _pick_tile(m, kv_tile_cap)
    n_q, n_kv = n // tq, m // tkv

    kernel = functools.partial(_fused_cross_attention_kernel,
                               heads=heads, dim_head=dim_head, scale=scale)

    cost = pl.CostEstimate(
        flops=2 * b * (n * cq * inner + 2 * m * cc * inner)
              + 4 * b * heads * n * m * dim_head,
        transcendentals=b * heads * n * m,
        bytes_accessed=4 * (b * n * cq + b * m * cc
                            + inner * (cq + 2 * cc) + b * n * inner))

    return pl.pallas_call(
        kernel,
        out_shape=jax.ShapeDtypeStruct((b, n, inner), x.dtype),
        grid_spec=pltpu.PrefetchScalarGridSpec(
            num_scalar_prefetch=0,
            grid=(b, n_q, n_kv),
            in_specs=[
                pl.BlockSpec((1, tq, cq), lambda bi, qi, ki: (bi, qi, 0)),
                pl.BlockSpec((1, tkv, cc), lambda bi, qi, ki: (bi, ki, 0)),
                # weights: constant block index -> DMA'd once, stay resident in VMEM
                pl.BlockSpec((inner, cq), lambda bi, qi, ki: (0, 0)),
                pl.BlockSpec((inner, cc), lambda bi, qi, ki: (0, 0)),
                pl.BlockSpec((inner, cc), lambda bi, qi, ki: (0, 0)),
            ],
            out_specs=pl.BlockSpec((1, tq, inner), lambda bi, qi, ki: (bi, qi, 0)),
            scratch_shapes=[
                pltpu.VMEM((heads, tq, dim_head), jnp.bfloat16),  # scaled Q
                pltpu.VMEM((heads, tq, 1), jnp.float32),          # running max
                pltpu.VMEM((heads, tq, 1), jnp.float32),          # running denom
                pltpu.VMEM((heads, tq, dim_head), jnp.float32),   # running numerator
            ]),
        compiler_params=pltpu.CompilerParams(
            dimension_semantics=("parallel", "parallel", "arbitrary")),
        cost_estimate=cost,
    )(x, context, w_q, w_k, w_v)


# ---------------------------------------------------------------------------
# CrossAttention module (JAX glue around the fused kernel)
# ---------------------------------------------------------------------------

class CrossAttention:
    def __init__(self, query_dim, context_dim=None, heads=8, dim_head=64,
                 inner_dim=64 * 8, dropout=0.0, *, key):
        context_dim = query_dim if context_dim is None else context_dim
        self.scale = dim_head ** (-0.5)
        self.heads = heads
        self.inner_dim = inner_dim
        self.dim_head = inner_dim // heads

        kq, kk, kv = jax.random.split(key, 3)
        # PyTorch Linear weight shape: (out_features, in_features); kept as-is (no .T).
        self.w_q = jax.random.normal(kq, (inner_dim, query_dim), jnp.float32) * 0.02
        self.w_k = jax.random.normal(kk, (inner_dim, context_dim), jnp.float32) * 0.02
        self.w_v = jax.random.normal(kv, (inner_dim, context_dim), jnp.float32) * 0.02

    def __call__(self, x, context=None, mask=None, *, q_tile_cap=256, kv_tile_cap=512):
        assert mask is None, "mask path not implemented"  # TODO(synk): mask support
        context = x if context is None else context
        return cross_attention_forward(
            x, context, self.w_q, self.w_k, self.w_v,
            heads=self.heads, dim_head=self.dim_head, scale=self.scale,
            q_tile_cap=q_tile_cap, kv_tile_cap=kv_tile_cap)


# ---------------------------------------------------------------------------
# Reference (pure JAX, f32) for a sanity check
# ---------------------------------------------------------------------------

def reference_forward(mod, x, context=None):
    h = mod.heads
    b, n, _ = x.shape
    context = x if context is None else context
    _, m_, _ = context.shape
    q = jnp.einsum('bnc,oc->bno', x, mod.w_q, precision='highest')
    k = jnp.einsum('bmc,oc->bmo', context, mod.w_k, precision='highest')
    v = jnp.einsum('bmc,oc->bmo', context, mod.w_v, precision='highest')
    d = mod.inner_dim // h
    q = q.reshape(b, n, h, d).transpose(0, 2, 1, 3)
    k = k.reshape(b, m_, h, d).transpose(0, 2, 1, 3)
    v = v.reshape(b, m_, h, d).transpose(0, 2, 1, 3)
    sim = jnp.einsum('bhid,bhjd->bhij', q, k, precision='highest') * mod.scale
    attn = jax.nn.softmax(sim, axis=-1)
    out = jnp.einsum('bhij,bhjd->bhid', attn, v, precision='highest')
    return out.transpose(0, 2, 1, 3).reshape(b, n, h * d)


# ---------------------------------------------------------------------------
# Main
# ---------------------------------------------------------------------------

if __name__ == "__main__":
    key = jax.random.PRNGKey(0)
    k_params, k_x, k_ctx = jax.random.split(key, 3)

    # bf16 MXU matmuls with f32 accumulation -> compare against f32 reference at ~1e-2
    RTOL, ATOL = 2e-2, 2e-2

    # Test 1: small cross-attention shapes (single kv tile)
    B, N, M = 2, 8, 8
    QUERY_DIM = CONTEXT_DIM = 32
    HEADS, DIM_HEAD = 2, 16
    INNER_DIM = HEADS * DIM_HEAD

    mod = CrossAttention(QUERY_DIM, context_dim=CONTEXT_DIM, heads=HEADS,
                         dim_head=DIM_HEAD, inner_dim=INNER_DIM, key=k_params)
    x = jax.random.normal(k_x, (B, N, QUERY_DIM), jnp.float32)
    context = jax.random.normal(k_ctx, (B, M, CONTEXT_DIM), jnp.float32)

    out = jax.block_until_ready(mod(x, context=context))
    ref = reference_forward(mod, x, context=context)
    assert out.shape == (B, N, INNER_DIM)
    assert jnp.allclose(out, ref, rtol=RTOL, atol=ATOL), (
        f"cross-attn max abs err {jnp.max(jnp.abs(out - ref))}")

    # Test 1b: self-attention path (context=None)
    out_sa = jax.block_until_ready(mod(x))
    ref_sa = reference_forward(mod, x, context=None)
    assert jnp.allclose(out_sa, ref_sa, rtol=RTOL, atol=ATOL), (
        f"self-attn max abs err {jnp.max(jnp.abs(out_sa - ref_sa))}")

    # Test 2: force small tiles to exercise the kv-tiled online-softmax (flash) path
    B2, N2, M2 = 2, 16, 32
    HEADS2, DIM_HEAD2 = 4, 16
    INNER2 = HEADS2 * DIM_HEAD2
    mod2 = CrossAttention(QUERY_DIM, context_dim=CONTEXT_DIM, heads=HEADS2,
                          dim_head=DIM_HEAD2, inner_dim=INNER2, key=k_params)
    x2 = jax.random.normal(jax.random.PRNGKey(1), (B2, N2, QUERY_DIM), jnp.float32)
    ctx2 = jax.random.normal(jax.random.PRNGKey(2), (B2, M2, CONTEXT_DIM), jnp.float32)
    out2 = jax.block_until_ready(
        mod2(x2, context=ctx2, q_tile_cap=8, kv_tile_cap=8))   # grid (2, 2, 4)
    ref2 = reference_forward(mod2, x2, context=ctx2)
    assert out2.shape == (B2, N2, INNER2)
    assert jnp.allclose(out2, ref2, rtol=RTOL, atol=ATOL), (
        f"flash path max abs err {jnp.max(jnp.abs(out2 - ref2))}")

    print("KERNEL_OK")
</pallas_src>

<mosaic_0001>
module attributes {stable_mosaic.version = 11 : i64} {
  func.func @_fused_cross_attention_kernel(%arg0: i32, %arg1: i32, %arg2: i32, %arg3: memref<1x8x32xf32, #tpu.memory_space<vmem>>, %arg4: memref<1x8x32xf32, #tpu.memory_space<vmem>>, %arg5: memref<32x32xf32, #tpu.memory_space<vmem>>, %arg6: memref<32x32xf32, #tpu.memory_space<vmem>>, %arg7: memref<32x32xf32, #tpu.memory_space<vmem>>, %arg8: memref<1x8x32xf32, #tpu.memory_space<vmem>>, %arg9: memref<2x8x16xbf16, #tpu.memory_space<vmem>>, %arg10: memref<2x8x1xf32, #tpu.memory_space<vmem>>, %arg11: memref<2x8x1xf32, #tpu.memory_space<vmem>>, %arg12: memref<2x8x16xf32, #tpu.memory_space<vmem>>) attributes {dimension_semantics = [#tpu.dimension_semantics<parallel>, #tpu.dimension_semantics<parallel>, #tpu.dimension_semantics<arbitrary>], iteration_bounds = array<i64: 2, 1, 1>, scalar_prefetch = 0 : i64, scratch_operands = 4 : i64, tpu.core_type = #tpu.core_type<tc>, window_params = [{transform_indices = @transform_0, window_bounds = array<i64: 1, 8, 32>}, {transform_indices = @transform_1, window_bounds = array<i64: 1, 8, 32>}, {pipeline_mode = #tpu.pipeline_mode<synchronous>, transform_indices = @transform_2, window_bounds = array<i64: 32, 32>}, {pipeline_mode = #tpu.pipeline_mode<synchronous>, transform_indices = @transform_3, window_bounds = array<i64: 32, 32>}, {pipeline_mode = #tpu.pipeline_mode<synchronous>, transform_indices = @transform_4, window_bounds = array<i64: 32, 32>}, {transform_indices = @transform_5, window_bounds = array<i64: 1, 8, 32>}]} {
    %c0_i32 = arith.constant 0 : i32
    %0 = arith.cmpi eq, %arg2, %c0_i32 : i32
    %1 = arith.extui %0 : i1 to i32
    %c0_i32_0 = arith.constant 0 : i32
    %2 = arith.cmpi ne, %1, %c0_i32_0 : i32
    scf.if %2 {
      %c0_35 = arith.constant 0 : index
      %c0_36 = arith.constant 0 : index
      %c0_37 = arith.constant 0 : index
      %46 = vector.load %arg3[%c0_35, %c0_36, %c0_37] : memref<1x8x32xf32, #tpu.memory_space<vmem>>, vector<1x8x32xf32>
      %47 = vector.shape_cast %46 : vector<1x8x32xf32> to vector<8x32xf32>
      %48 = arith.truncf %47 : vector<8x32xf32> to vector<8x32xbf16>
      %c0_38 = arith.constant 0 : index
      %c0_39 = arith.constant 0 : index
      %49 = vector.load %arg5[%c0_38, %c0_39] : memref<32x32xf32, #tpu.memory_space<vmem>>, vector<32x32xf32>
      %50 = arith.truncf %49 : vector<32x32xf32> to vector<32x32xbf16>
      %cst_40 = arith.constant dense<0.000000e+00> : vector<8x32xf32>
      %51 = tpu.matmul %48, %50, %cst_40 {dimension_numbers = #tpu.dot_dimension_numbers<[1], [1], [0], [0], [0, 0, 1, 0], [], []>} : vector<8x32xbf16>, vector<32x32xbf16>, vector<8x32xf32> -> vector<8x32xf32>
      %cst_41 = arith.constant 2.500000e-01 : f32
      %52 = vector.broadcast %cst_41 : f32 to vector<8x32xf32>
      %53 = arith.mulf %51, %52 : vector<8x32xf32>
      %54 = vector.shape_cast %53 : vector<8x32xf32> to vector<8x2x16xf32>
      %55 = tpu.transpose %54, [1, 0, 2] : vector<8x2x16xf32> -> vector<2x8x16xf32>
      %56 = arith.truncf %55 : vector<2x8x16xf32> to vector<2x8x16xbf16>
      %c0_42 = arith.constant 0 : index
      %c0_43 = arith.constant 0 : index
      %c0_44 = arith.constant 0 : index
      %57 = vector.load %arg9[%c0_42, %c0_43, %c0_44] : memref<2x8x16xbf16, #tpu.memory_space<vmem>>, vector<2x8x16xbf16>
      tpu.vector_store %arg9[%c0_42, %c0_43, %c0_44], %56 {strides = array<i32>} : memref<2x8x16xbf16, #tpu.memory_space<vmem>>, vector<2x8x16xbf16>,
      %cst_45 = arith.constant 0xFF800000 : f32
      %58 = vector.broadcast %cst_45 : f32 to vector<2x8x1xf32>
      %c0_46 = arith.constant 0 : index
      %c0_47 = arith.constant 0 : index
      %c0_48 = arith.constant 0 : index
      %59 = vector.load %arg10[%c0_46, %c0_47, %c0_48] : memref<2x8x1xf32, #tpu.memory_space<vmem>>, vector<2x8x1xf32>
      tpu.vector_store %arg10[%c0_46, %c0_47, %c0_48], %58 {strides = array<i32>} : memref<2x8x1xf32, #tpu.memory_space<vmem>>, vector<2x8x1xf32>,
      %cst_49 = arith.constant 0.000000e+00 : f32
      %60 = vector.broadcast %cst_49 : f32 to vector<2x8x1xf32>
      %c0_50 = arith.constant 0 : index
      %c0_51 = arith.constant 0 : index
      %c0_52 = arith.constant 0 : index
      %61 = vector.load %arg11[%c0_50, %c0_51, %c0_52] : memref<2x8x1xf32, #tpu.memory_space<vmem>>, vector<2x8x1xf32>
      tpu.vector_store %arg11[%c0_50, %c0_51, %c0_52], %60 {strides = array<i32>} : memref<2x8x1xf32, #tpu.memory_space<vmem>>, vector<2x8x1xf32>,
      %cst_53 = arith.constant 0.000000e+00 : f32
      %62 = vector.broadcast %cst_53 : f32 to vector<2x8x16xf32>
      %c0_54 = arith.constant 0 : index
      %c0_55 = arith.constant 0 : index
      %c0_56 = arith.constant 0 : index
      %63 = vector.load %arg12[%c0_54, %c0_55, %c0_56] : memref<2x8x16xf32, #tpu.memory_space<vmem>>, vector<2x8x16xf32>
      tpu.vector_store %arg12[%c0_54, %c0_55, %c0_56], %62 {strides = array<i32>} : memref<2x8x16xf32, #tpu.memory_space<vmem>>, vector<2x8x16xf32>,
    } else {
    }
    %c0 = arith.constant 0 : index
    %c0_1 = arith.constant 0 : index
    %c0_2 = arith.constant 0 : index
    %3 = vector.load %arg4[%c0, %c0_1, %c0_2] : memref<1x8x32xf32, #tpu.memory_space<vmem>>, vector<1x8x32xf32>
    %4 = vector.shape_cast %3 : vector<1x8x32xf32> to vector<8x32xf32>
    %5 = arith.truncf %4 : vector<8x32xf32> to vector<8x32xbf16>
    %c0_3 = arith.constant 0 : index
    %c0_4 = arith.constant 0 : index
    %6 = vector.load %arg6[%c0_3, %c0_4] : memref<32x32xf32, #tpu.memory_space<vmem>>, vector<32x32xf32>
    %7 = arith.truncf %6 : vector<32x32xf32> to vector<32x32xbf16>
    %c0_5 = arith.constant 0 : index
    %c0_6 = arith.constant 0 : index
    %8 = vector.load %arg7[%c0_5, %c0_6] : memref<32x32xf32, #tpu.memory_space<vmem>>, vector<32x32xf32>
    %9 = arith.truncf %8 : vector<32x32xf32> to vector<32x32xbf16>
    %cst = arith.constant dense<0.000000e+00> : vector<8x32xf32>
    %10 = tpu.matmul %5, %7, %cst {dimension_numbers = #tpu.dot_dimension_numbers<[1], [1], [0], [0], [0, 0, 1, 0], [], []>} : vector<8x32xbf16>, vector<32x32xbf16>, vector<8x32xf32> -> vector<8x32xf32>
    %cst_7 = arith.constant dense<0.000000e+00> : vector<8x32xf32>
    %11 = tpu.matmul %5, %9, %cst_7 {dimension_numbers = #tpu.dot_dimension_numbers<[1], [1], [0], [0], [0, 0, 1, 0], [], []>} : vector<8x32xbf16>, vector<32x32xbf16>, vector<8x32xf32> -> vector<8x32xf32>
    %12 = vector.shape_cast %10 : vector<8x32xf32> to vector<8x2x16xf32>
    %13 = tpu.transpose %12, [1, 0, 2] : vector<8x2x16xf32> -> vector<2x8x16xf32>
    %14 = arith.truncf %13 : vector<2x8x16xf32> to vector<2x8x16xbf16>
    %15 = vector.shape_cast %11 : vector<8x32xf32> to vector<8x2x16xf32>
    %16 = tpu.transpose %15, [1, 0, 2] : vector<8x2x16xf32> -> vector<2x8x16xf32>
    %17 = arith.truncf %16 : vector<2x8x16xf32> to vector<2x8x16xbf16>
    %c0_8 = arith.constant 0 : index
    %c0_9 = arith.constant 0 : index
    %c0_10 = arith.constant 0 : index
    %18 = vector.load %arg9[%c0_8, %c0_9, %c0_10] : memref<2x8x16xbf16, #tpu.memory_space<vmem>>, vector<2x8x16xbf16>
    "tpu.trace_start"() <{level = 10 : i32, message = "hnd,hmd->hnm"}> : () -> ()
    %cst_11 = arith.constant dense<0.000000e+00> : vector<2x8x8xf32>
    %19 = tpu.matmul %18, %14, %cst_11 {dimension_numbers = #tpu.dot_dimension_numbers<[2], [2], [1], [1], [0, 0, 0, 1, 1, 1], [0], [0]>} : vector<2x8x16xbf16>, vector<2x8x16xbf16>, vector<2x8x8xf32> -> vector<2x8x8xf32>
    "tpu.trace_stop"() : () -> ()
    %c0_12 = arith.constant 0 : index
    %c0_13 = arith.constant 0 : index
    %c0_14 = arith.constant 0 : index
    %20 = vector.load %arg10[%c0_12, %c0_13, %c0_14] : memref<2x8x1xf32, #tpu.memory_space<vmem>>, vector<2x8x1xf32>
    %cst_15 = arith.constant dense<0xFF800000> : vector<2x8xf32>
    %21 = vector.multi_reduction <maximumf>, %19, %cst_15 [2] : vector<2x8x8xf32> to vector<2x8xf32>
    %22 = vector.shape_cast %21 : vector<2x8xf32> to vector<2x8x1xf32>
    %23 = arith.maximumf %20, %22 : vector<2x8x1xf32>
    %24 = arith.subf %20, %23 : vector<2x8x1xf32>
    %25 = math.exp %24 : vector<2x8x1xf32>
    %26 = vector.broadcast %23 : vector<2x8x1xf32> to vector<2x8x8xf32>
    %27 = arith.subf %19, %26 : vector<2x8x8xf32>
    %28 = math.exp %27 : vector<2x8x8xf32>
    %c0_16 = arith.constant 0 : index
    %c0_17 = arith.constant 0 : index
    %c0_18 = arith.constant 0 : index
    %29 = vector.load %arg11[%c0_16, %c0_17, %c0_18] : memref<2x8x1xf32, #tpu.memory_space<vmem>>, vector<2x8x1xf32>
    %30 = arith.mulf %25, %29 : vector<2x8x1xf32>
    %cst_19 = arith.constant dense<0.000000e+00> : vector<2x8xf32>
    %31 = vector.multi_reduction <add>, %28, %cst_19 [2] : vector<2x8x8xf32> to vector<2x8xf32>
    %32 = vector.shape_cast %31 : vector<2x8xf32> to vector<2x8x1xf32>
    %33 = arith.addf %30, %32 : vector<2x8x1xf32>
    %c0_20 = arith.constant 0 : index
    %c0_21 = arith.constant 0 : index
    %c0_22 = arith.constant 0 : index
    %34 = vector.load %arg11[%c0_20, %c0_21, %c0_22] : memref<2x8x1xf32, #tpu.memory_space<vmem>>, vector<2x8x1xf32>
    tpu.vector_store %arg11[%c0_20, %c0_21, %c0_22], %33 {strides = array<i32>} : memref<2x8x1xf32, #tpu.memory_space<vmem>>, vector<2x8x1xf32>,
    %c0_23 = arith.constant 0 : index
    %c0_24 = arith.constant 0 : index
    %c0_25 = arith.constant 0 : index
    %35 = vector.load %arg12[%c0_23, %c0_24, %c0_25] : memref<2x8x16xf32, #tpu.memory_space<vmem>>, vector<2x8x16xf32>
    %36 = vector.broadcast %25 : vector<2x8x1xf32> to vector<2x8x16xf32>
    %37 = arith.mulf %36, %35 : vector<2x8x16xf32>
    %38 = arith.truncf %28 : vector<2x8x8xf32> to vector<2x8x8xbf16>
    "tpu.trace_start"() <{level = 10 : i32, message = "hnm,hmd->hnd"}> : () -> ()
    %cst_26 = arith.constant dense<0.000000e+00> : vector<2x8x16xf32>
    %39 = tpu.matmul %38, %17, %cst_26 {dimension_numbers = #tpu.dot_dimension_numbers<[2], [1], [1], [2], [0, 0, 0, 1, 1, 2], [0], [0]>} : vector<2x8x8xbf16>, vector<2x8x16xbf16>, vector<2x8x16xf32> -> vector<2x8x16xf32>
    "tpu.trace_stop"() : () -> ()
    %40 = arith.addf %37, %39 : vector<2x8x16xf32>
    %c0_27 = arith.constant 0 : index
    %c0_28 = arith.constant 0 : index
    %c0_29 = arith.constant 0 : index
    %41 = vector.load %arg12[%c0_27, %c0_28, %c0_29] : memref<2x8x16xf32, #tpu.memory_space<vmem>>, vector<2x8x16xf32>
    tpu.vector_store %arg12[%c0_27, %c0_28, %c0_29], %40 {strides = array<i32>} : memref<2x8x16xf32, #tpu.memory_space<vmem>>, vector<2x8x16xf32>,
    %c0_30 = arith.constant 0 : index
    %c0_31 = arith.constant 0 : index
    %c0_32 = arith.constant 0 : index
    %42 = vector.load %arg10[%c0_30, %c0_31, %c0_32] : memref<2x8x1xf32, #tpu.memory_space<vmem>>, vector<2x8x1xf32>
    tpu.vector_store %arg10[%c0_30, %c0_31, %c0_32], %23 {strides = array<i32>} : memref<2x8x1xf32, #tpu.memory_space<vmem>>, vector<2x8x1xf32>,
    %c0_i32_33 = arith.constant 0 : i32
    %43 = arith.cmpi eq, %arg2, %c0_i32_33 : i32
    %44 = arith.extui %43 : i1 to i32
    %c0_i32_34 = arith.constant 0 : i32
    %45 = arith.cmpi ne, %44, %c0_i32_34 : i32
    scf.if %45 {
      %c0_35 = arith.constant 0 : index
      %c0_36 = arith.constant 0 : index
      %c0_37 = arith.constant 0 : index
      %46 = vector.load %arg12[%c0_35, %c0_36, %c0_37] : memref<2x8x16xf32, #tpu.memory_space<vmem>>, vector<2x8x16xf32>
      %c0_38 = arith.constant 0 : index
      %c0_39 = arith.constant 0 : index
      %c0_40 = arith.constant 0 : index
      %47 = vector.load %arg11[%c0_38, %c0_39, %c0_40] : memref<2x8x1xf32, #tpu.memory_space<vmem>>, vector<2x8x1xf32>
      %48 = tpu.reciprocal %47 {approx = true} : vector<2x8x1xf32> -> vector<2x8x1xf32>
      %49 = vector.broadcast %48 : vector<2x8x1xf32> to vector<2x8x16xf32>
      %50 = arith.mulf %46, %49 : vector<2x8x16xf32>
      %51 = tpu.transpose %50, [1, 0, 2] : vector<2x8x16xf32> -> vector<8x2x16xf32>
      %52 = vector.shape_cast %51 : vector<8x2x16xf32> to vector<8x32xf32>
      %c0_41 = arith.constant 0 : index
      %c0_42 = arith.constant 0 : index
      %c0_43 = arith.constant 0 : index
      %53 = vector.load %arg8[%c0_41, %c0_42, %c0_43] : memref<1x8x32xf32, #tpu.memory_space<vmem>>, vector<1x8x32xf32>
      %54 = vector.shape_cast %53 : vector<1x8x32xf32> to vector<8x32xf32>
      %55 = vector.shape_cast %52 : vector<8x32xf32> to vector<1x8x32xf32>
      tpu.vector_store %arg8[%c0_41, %c0_42, %c0_43], %55 {strides = array<i32>} : memref<1x8x32xf32, #tpu.memory_space<vmem>>, vector<1x8x32xf32>,
    } else {
    }
    return
  }
  func.func @transform_0(%arg0: i32, %arg1: i32, %arg2: i32) -> (i32, i32, i32) {
    %c0_i32 = arith.constant 0 : i32
    %c0_i32_0 = arith.constant 0 : i32
    return %arg0, %arg1, %c0_i32 : i32, i32, i32
  }
  func.func @transform_1(%arg0: i32, %arg1: i32, %arg2: i32) -> (i32, i32, i32) {
    %c0_i32 = arith.constant 0 : i32
    %c0_i32_0 = arith.constant 0 : i32
    return %arg0, %arg2, %c0_i32 : i32, i32, i32
  }
  func.func @transform_2(%arg0: i32, %arg1: i32, %arg2: i32) -> (i32, i32) {
    %c0_i32 = arith.constant 0 : i32
    %c0_i32_0 = arith.constant 0 : i32
    %c0_i32_1 = arith.constant 0 : i32
    return %c0_i32, %c0_i32_0 : i32, i32
  }
  func.func @transform_3(%arg0: i32, %arg1: i32, %arg2: i32) -> (i32, i32) {
    %c0_i32 = arith.constant 0 : i32
    %c0_i32_0 = arith.constant 0 : i32
    %c0_i32_1 = arith.constant 0 : i32
    return %c0_i32, %c0_i32_0 : i32, i32
  }
  func.func @transform_4(%arg0: i32, %arg1: i32, %arg2: i32) -> (i32, i32) {
    %c0_i32 = arith.constant 0 : i32
    %c0_i32_0 = arith.constant 0 : i32
    %c0_i32_1 = arith.constant 0 : i32
    return %c0_i32, %c0_i32_0 : i32, i32
  }
  func.func @transform_5(%arg0: i32, %arg1: i32, %arg2: i32) -> (i32, i32, i32) {
    %c0_i32 = arith.constant 0 : i32
    %c0_i32_0 = arith.constant 0 : i32
    return %arg0, %arg1, %c0_i32 : i32, i32, i32
  }
}

</mosaic_0001>

<bundles_post_ra>
// kernel: tpu_custom_call.1
= control target key start
LH: loop header
LB: loop body
LE: loop exit
PB: predicated region body
PF: predicated region fallthrough
CT: control target
= control target key end

     0   :  { %s2296_s0 = inlined_call_operand.hbm [shape: f32[2,8,32], index: 0, kind: input, shape index: {}]   ;;  %s2297_s1 = inlined_call_operand.hbm [shape: f32[2,8,32], index: 1, kind: input, shape index: {}]   ;;  %s2298_s2 = inlined_call_operand.hbm [shape: f32[32,32], index: 2, kind: input, shape index: {}]   ;;  %s2299_s3 = inlined_call_operand.hbm [shape: f32[32,32], index: 3, kind: input, shape index: {}]   ;;  %s2300_s4 = inlined_call_operand.hbm [shape: f32[32,32], index: 4, kind: input, shape index: {}]   ;;  %s2301_s5 = inlined_call_operand.hbm [shape: f32[2,8,32], index: 5, kind: output, shape index: {}]  }
   0x1   :  { %2304 = sst [smem:[#allocation21_spill]] %s2296_s0 }
   0x2   :  { %2305 = sst [smem:[#allocation22_spill]] %s2298_s2 }
   0x3   :  { %2306 = sst [smem:[#allocation23_spill]] %s2299_s3 }
   0x4   :  { %10 = vsyncpa [#allocation7], 0 }
   0x5   :  { %12 = vsyncpa [#allocation7 + $0x1], 0 }
   0x6   :  { %13 = vsyncpa [#allocation10], 0 }
   0x7   :  { %15 = vsyncpa [#allocation10 + $0x1], 0 }
   0x8   :  { %16 = vsyncpa [#allocation13], 0 }
   0x9   :  { %17 = vsyncpa [#allocation8], 0 }
   0xa   :  { %19 = vsyncpa [#allocation8 + $0x1], 0  ;;  %s1947_s18 = smov 0   ;;  %s1949_s19 = smov 0  }
   0xb   :  { %s1951_s20 = smov 0   ;;  %s1953_s21 = smov 0  }
   0xc   :  { %s1955_s22 = smov 0   ;;  %s1957_s23 = smov 0  }
   0xd LB: > { %s1978_s24 = sadd.s32 4294967295, %s1899_s23   ;;  %s1450_s25 = sadd.s32 4294967294, %s1899_s23   ;;  %s1899_s23 = sphi %s1957_s23, %s25_s23   ;;  %s1895_s22 = sphi %s1955_s22, %s2328_s22   ;;  %s1891_s21 = sphi %s1953_s21, %s2327_s21   ;;  %s1887_s20 = sphi %s1951_s20, %s2326_s20   ;;  %s1883_s19 = sphi %s1949_s19, %s2325_s19   ;;  %s1879_s18 = sphi %s1947_s18, %s2324_s18  }
   0xe   : > { %p66_p0 = scmp.ne.s32.totalorder %s1883_s19, %s1879_s18  ;;  %p2302_p1 = scmp.eq.s32.totalorder %s1978_s24, 0 }
   0xf   : > { %p189_p3 = scmp.eq.s32.totalorder %s1450_s25, 1  ;;  %p1451_p5 = scmp.ge.s32.totalorder %s1899_s23, 1 }
  0x10   : > { %p1987_p4 = por %p2302_p1, %p66_p0  ;;  %p196_p7 = scmp.lt.s32.totalorder %s1899_s23, 3 }
  0x11   : > { %p1992_p6 = por %p189_p3, %p66_p0  ;;  %s1901_s29 = smov [#allocation11]  }
  0x12   : > { %s2307_s26 = scalar_select %p1987_p4, 1, 0 }
  0x13   : > { %s2308_s27 = scalar_select %p1992_p6, 1, 0 }
  0x14   : > { %p1997_p8 = pnand %p1451_p5, %p196_p7  ;;  %s208_s30 = sshll.u32 %s1901_s29, 4  ;;  %s209_s30 = int_to_ptr.vmem [resolvable:$true] %s208_s30 }
  0x15   : > { %s1902_s7 = smov [#allocation12]   ;;  %s1903_s9 = smov [#allocation14]  }
  0x16   : > { %p1569_p9 = pneg %p1997_p8  ;;  %s221_s8 = sshll.u32 %s1902_s7, 4  ;;  %s222_s8 = int_to_ptr.vmem [resolvable:$true] %s221_s8 }
  0x17   : > { %s234_s10 = sshll.u32 %s1903_s9, 4  ;;  %s1684_s11 = scalar_lea.vmem %s209_s30, 512  ;;  %s235_s10 = int_to_ptr.vmem [resolvable:$true] %s234_s10 }
  0x18   : > { %p2006_p11 = pnand %p1569_p9, %p2302_p1  ;;  %p1685_p13 = scmp.ne.s32.totalorder %s209_s30, %s1684_s11 }
  0x19   : > { %p1692_p5 = scmp.lt.s32.totalorder %s209_s30, %s209_s30  ;;  %p1693_p7 = scmp.lt.s32.totalorder %s1684_s11, %s1684_s11 }
  0x1a   : > { %p1675_p12 = pneg %p2006_p11 }
  0x1b   : > { %p1694_p9 = por %p1693_p7, %p1692_p5 }
  0x1c   : > { %p1687_p0 = pnand %p1685_p13, %p1675_p12 }
  0x1e   : > { %p1688_p3 = pneg %p1687_p0 }
  0x20   : > { %p1695_p10 = pnand %p1694_p9, %p1688_p3 }
  0x22   : > { %1698 = shalt.err (!%p1695_p10)
}
  0x23   : > { %s1904_s12 = smov 128   ;;  %s1905_s13 = smov 8  }
  0x24   : > { %s2311_s2 = sld [smem:[#allocation22_spill]]  ;;  %s1710_s16 = scalar_lea.vmem %s222_s8, 512 }
  0x25   : > { %p1711_p1 = scmp.ne.s32.totalorder %s222_s8, %s1710_s16  ;;  %p1718_p2 = scmp.lt.s32.totalorder %s222_s8, %s222_s8 }
  0x26   : > { %p1719_p6 = scmp.lt.s32.totalorder %s1710_s16, %s1710_s16 }
  0x27   : > { %p1713_p13 = pnand %p1711_p1, %p1675_p12 }
  0x28   : > { %p1720_p5 = por %p1719_p6, %p1718_p2 }
  0x29   : > { %p1714_p0 = pneg %p1713_p13 }
  0x2a   : > { %1572 = dma.hbm_to_vmem [thread:$0]  (!%p2006_p11), %s2311_s2, 512, %s209_s30, [#allocation10], %s1904_s12, %s1904_s12, %s1905_s13  }
  0x2b   : > { %p1721_p3 = pnand %p1720_p5, %p1714_p0 }
  0x2d   : > { %1724 = shalt.err (!%p1721_p3)
}
  0x2e   : > { %s2312_s3 = sld [smem:[#allocation23_spill]]  ;;  %s1736_s29 = scalar_lea.vmem %s235_s10, 512 }
  0x2f   : > { %p1737_p10 = scmp.ne.s32.totalorder %s235_s10, %s1736_s29  ;;  %p1744_p9 = scmp.lt.s32.totalorder %s235_s10, %s235_s10 }
  0x30   : > { %p1745_p13 = scmp.lt.s32.totalorder %s1736_s29, %s1736_s29 }
  0x31   : > { %p1739_p7 = pnand %p1737_p10, %p1675_p12 }
  0x32   : > { %p1746_p4 = por %p1745_p13, %p1744_p9 }
  0x33   : > { %p1740_p1 = pneg %p1739_p7 }
  0x34   : > { %1575 = dma.hbm_to_vmem [thread:$0]  (!%p2006_p11), %s2312_s3, 512, %s222_s8, [#allocation13], %s1904_s12, %s1904_s12, %s1905_s13  }
  0x35   : > { %p1747_p2 = pnand %p1746_p4, %p1740_p1 }
  0x37   : > { %1750 = shalt.err (!%p1747_p2)
}
  0x38   : > { %1578 = dma.hbm_to_vmem [thread:$0]  (!%p2006_p11), %s2300_s4, 512, %s235_s10, [#allocation13], %s1904_s12, %s1904_s12, %s1905_s13  }
  0x39   : > { %s53_s8 = sadd.s32 1, %s1887_s20  ;;  %s44_s9 = sadd.s32 1, %s1895_s22 }
  0x3a   : > { %p60_p4 = scmp.ne.s32.totalorder %s1887_s20, %s1883_s19  ;;  %p46_p6 = scmp.ge.s32.totalorder %s44_s9, 2 }
  0x3b   : > { %p61_p12 = scmp.eq.s32.totalorder %s1899_s23, 0  ;;  %p2313_p0 = scmp.eq.s32.totalorder %s1978_s24, 1 }
  0x3c   : > { %p1593_p3 = scmp.lt.s32.totalorder %s1899_s23, 2  ;;  %s2330_s9 = smov (%p46_p6, %s44_s9), 0 }
  0x3d   : > { %p2043_p5 = por %p2313_p0, %p60_p4  ;;  %p62_p10 = por %p61_p12, %p60_p4 }
  0x3e   : > { %s248_s11 = sand.u32 1, %s1887_s20   ;;  %s48_s14 = ssub.s32 %s1895_s22, %s2330_s9 }
  0x3f   : > { %p51_p11 = scmp.eq.s32.totalorder %s48_s14, 0  ;;  %s1456_s10 = sshll.u32 %s248_s11, 3 }
  0x40   : > { %s1457_s12 = sshll.u32 %s1895_s22, 7  ;;  %s2315_s0 = sld [smem:[#allocation21_spill]] }
  0x41   : > { %s2055_s13 = scalar_select %p51_p11, %s1887_s20, %s53_s8  }
  0x42   : > { %s252_s25 = scalar_lea.vmem [#allocation6], %s1456_s10  ;;  %p2062_p7 = pnand %p1593_p3, %p62_p10 }
  0x43   : > { %s260_s29 = sshll.u32 %s252_s25, 4  ;;  %s2069_s14 = scalar_lea.hbm %s2297_s1, %s1457_s12  ;;  %s261_s29 = int_to_ptr.vmem [resolvable:$true] %s260_s29 }
  0x44   : > { %s267_s8 = sand.u32 1, %s1899_s23   ;;  %s249_s3 = scalar_lea.sflag [#allocation7], %s248_s11 }
  0x45   : > { %p1753_p1 = pneg %p2062_p7  ;;  %s1764_s15 = scalar_lea.vmem %s261_s29, 128 }
  0x46   : > { %s258_s17 = scalar_lea.hbm %s2315_s0, %s1457_s12  ;;  %p1765_p9 = scmp.ne.s32.totalorder %s261_s29, %s1764_s15 }
  0x47   : > { %s1906_s16 = smov [#allocation6]  }
  0x48   : > { %p1767_p13 = pnand %p1765_p9, %p1753_p1  ;;  %s1769_s25 = sshll.u32 %s1906_s16, 4  ;;  %s1770_s25 = int_to_ptr.vmem [resolvable:$false] %s1769_s25 }
  0x49   : > { %s1771_s0 = scalar_lea.vmem %s1770_s25, 256  ;;  %p1772_p4 = scmp.lt.s32.totalorder %s261_s29, %s1770_s25 }
  0x4a   : > { %p1768_p2 = pneg %p1767_p13  ;;  %p1773_p6 = scmp.lt.s32.totalorder %s1771_s0, %s1764_s15 }
  0x4c   : > { %p1774_p12 = por %p1773_p6, %p1772_p4 }
  0x4e   : > { %p1775_p0 = pnand %p1774_p12, %p1768_p2 }
  0x50   : > { %1778 = shalt.err (!%p1775_p0)
}
  0x51   : > { %1582 = dma.hbm_to_vmem [thread:$0]  (!%p2062_p7), %s258_s17, 128, %s261_s29, %s249_s3  }
  0x52   : > { %s271_s2 = scalar_lea.vmem [#allocation9], %s1456_s10  ;;  %s268_s12 = scalar_lea.sflag [#allocation10], %s267_s8 }
  0x53   : > { %s279_s11 = sshll.u32 %s271_s2, 4  ;;  %s1907_s16 = smov [#allocation9]   ;;  %s280_s11 = int_to_ptr.vmem [resolvable:$true] %s279_s11 }
  0x54   : > { %s1792_s7 = scalar_lea.vmem %s280_s11, 128  ;;  %s1797_s25 = sshll.u32 %s1907_s16, 4  ;;  %s1798_s25 = int_to_ptr.vmem [resolvable:$false] %s1797_s25 }
  0x55   : > { %p1793_p3 = scmp.ne.s32.totalorder %s280_s11, %s1792_s7  ;;  %s1799_s0 = scalar_lea.vmem %s1798_s25, 256 }
  0x56   : > { %p1800_p9 = scmp.lt.s32.totalorder %s280_s11, %s1798_s25  ;;  %p1801_p13 = scmp.lt.s32.totalorder %s1799_s0, %s1792_s7 }
  0x57   : > { %p1795_p10 = pnand %p1793_p3, %p1753_p1 }
  0x58   : > { %p1802_p2 = por %p1801_p13, %p1800_p9 }
  0x59   : > { %p1796_p11 = pneg %p1795_p10 }
  0x5b   : > { %p1803_p4 = pnand %p1802_p2, %p1796_p11 }
  0x5d   : > { %1806 = shalt.err (!%p1803_p4)
}
  0x5e   : > { %1585 = dma.hbm_to_vmem [thread:$0]  (!%p2062_p7), %s2069_s14, 128, %s280_s11, %s268_s12  }
  0x5f   : > { %288 = sbr.rel (%p1997_p8) target bundleno = 1394 (0x572), region = 40  ;;  %s2088_s3 = sand.u32 (!%p1997_p8), 1, %s1883_s19  }
  0x60   : > { %s2091_s10 = sshll.u32 (!%p1997_p8), %s2088_s3, 3  ;;  %s291_s17 = scalar_lea.sflag (!%p1997_p8), [#allocation7], %s2088_s3 }
  0x61   : > { %s294_s29 = scalar_lea.vmem (!%p1997_p8), [#allocation6], %s2091_s10  ;;  %p2317_p1 = scmp.ne.s32.totalorder (!%p1997_p8), %s2307_s26, 0 }
  0x64   : > { %1858 = dma.done.wait (%p2317_p1), %s291_s17, 128  }
  0x65   : > { %1860 = vsyncadd (%p2317_p1), %s291_s17, 4294967168  ;;  %s299_s28 = sand.u32 1, %s1978_s24   ;;  %s303_s14 = scalar_lea.vmem [#allocation9], %s2091_s10 }
  0x66   : > { %s300_s30 = scalar_lea.sflag [#allocation10], %s299_s28 }
  0x67   : > { %1862 = dma.done.wait (%p2317_p1), %s300_s30, 128  }
  0x68   : > { %1864 = vsyncadd (%p2317_p1), %s300_s30, 4294967168  ;;  %p2318_p8 = scmp.eq.s32.totalorder %s1978_s24, 0 }
  0x6a   : > { %1866 = dma.done.wait (%p2318_p8), [#allocation10], 512   ;;  %p2319_p7 = pmov %p2318_p8 }
  0x6c   : > { %1868 = vsyncadd (%p2319_p7), [#allocation10], 4294966784  ;;  %p2320_p6 = pmov %p2319_p7 }
  0x6e   : > { %1870 = dma.done.wait (%p2320_p6), [#allocation13], 1024   ;;  %p2321_p12 = pmov %p2320_p6 }
  0x6f   : > { %v1908_v0 = vmov 0.0   ;;  %vm1909_vm0 = vmmov 0   ;;  %v356_v1 = vld [vmem:[#allocation11 + $0x10] sm:$0xff]  ;;  %v357_v2 = vld [vmem:[#allocation11 + $0x18] sm:$0xff]  ;;  %vm360_vm1 = vcmask 261120   ;;  %v354_v7 = vld [vmem:[#allocation11] sm:$0xff]  ;;  %v419_v40 = vlaneseq }
  0x70   : > { %1872 = vsyncadd (%p2321_p12), [#allocation13], 4294966272  ;;  %1503 = vmatprep.subr.bf16.mxu0 %v1908_v0  ;;  %1511 = vmatprep.subr.bf16.mxu1 %v1908_v0  ;;  %v548_v3 = vld [vmem:[#allocation12 + $0x10] sm:$0xff]  ;;  %v359_v4 = vpack.c.bf16 %v357_v2, %v356_v1  ;;  %v549_v5 = vld [vmem:[#allocation12 + $0x18] sm:$0xff]  ;;  %s1910_s24 = smov 112   ;;  %vm541_vm2 = vcmask 130048  }
  0x71   : > { %1507 = vmatprep.mubr.msk.bf16.mxu0 %vm1909_vm0, %v1908_v0  ;;  %1515 = vmatprep.mubr.msk.bf16.mxu1 %vm1909_vm0, %v1908_v0  ;;  %v551_v6 = vpack.c.bf16 %v549_v5, %v548_v3  ;;  %v355_v8 = vld [vmem:[#allocation11 + $0x8] sm:$0xff]  ;;  %v546_v10 = vld [vmem:[#allocation12] sm:$0xff]  ;;  %v544_v18 = vld [vmem:[%s303_s14] sm:$0xff]  ;;  %542 = vst.msk [vmem:[#allocation5] sm:$0xff] %vm541_vm2, %v1908_v0  ;;  %v1911_v38 = vmov 1983009808  }
  0x72   : > { %v368_v9 = vsel %vm360_vm1, %v359_v4, 0  ;;  %v547_v11 = vld [vmem:[#allocation12 + $0x8] sm:$0xff]  ;;  %v358_v13 = vpack.c.bf16 %v355_v8, %v354_v7  ;;  %v545_v20 = vpack.c.bf16 %v544_v18, %v544_v18  ;;  %543 = vst.msk [vmem:[#allocation5 + $0x8] sm:$0xff] %vm541_vm2, %v1908_v0  ;;  %v554_v30 = vld [vmem:[#allocation14 + $0x10] sm:$0xff]  ;;  %v555_v31 = vld [vmem:[#allocation14 + $0x18] sm:$0xff]  ;;  %v417_v39 = vunpack.c.l.s4 %v1911_v38  ;;  %s1915_s26 = smov 16  }
  0x73   : > { %1504 = vmatpush3.bf16.xpose.msra.mxu0 %v368_v9  ;;  %v566_v12 = vsel %vm360_vm1, %v551_v6, 0  ;;  %v550_v14 = vpack.c.bf16 %v547_v11, %v546_v10  ;;  %v352_v17 = vld [vmem:[%s294_s29] sm:$0xff]  ;;  %v557_v32 = vpack.c.bf16 %v555_v31, %v554_v30  ;;  %v420_v42 = vshrl.u32 %v419_v40, 7  ;;  %s1483_s8 = sshll.u32 %s1891_s21, 7  ;;  %s346_s15 = scalar_lea.vmem [#allocation15], %s2091_s10 }
  0x74   : > { %1512 = vmatpush3.bf16.xpose.msra.mxu1 %v566_v12  ;;  %1505 = vmatprep.subr.bf16.mxu0 %v1908_v0  ;;  %v365_v15 = vsel %vm360_vm1, %v358_v13, 0  ;;  %v353_v19 = vpack.c.bf16 %v352_v17, %v352_v17  ;;  %v552_v33 = vld [vmem:[#allocation14] sm:$0xff]  ;;  %v553_v34 = vld [vmem:[#allocation14 + $0x8] sm:$0xff]  ;;  %v418_v41 = vunpack.c.0.s8 %v417_v39  ;;  %v1912_v43 = vmov 1934713408   ;;  %s1314_s2 = sshll.u32 %s346_s15, 4  ;;  %s2252_s7 = scalar_lea.hbm %s2301_s5, %s1483_s8  ;;  %s1315_s2 = int_to_ptr.vmem [resolvable:$true] %s1314_s2 }
  0x75   : > { %1513 = vmatprep.subr.bf16.mxu1 %v1908_v0  ;;  %v563_v16 = vsel %vm360_vm1, %v550_v14, 0  ;;  %v612_v35 = vsel %vm360_vm1, %v557_v32, 0  ;;  %v556_v36 = vpack.c.bf16 %v553_v34, %v552_v33  ;;  %v448_v44 = vunpack.c.l.s4 %v1912_v43  ;;  %s1300_s16 = scalar_lea.sflag [#allocation8], %s2088_s3  ;;  %s1807_s25 = scalar_lea.vmem %s1315_s2, 128 }
  0x76   : > { %v2150_v45 = vsub.s32 %v418_v41, %v420_v42  ;;  %vm533_vm3 = vcmask 125952   ;;  %vm536_vm4 = vcmask 7168   ;;  %vm995_vm5 = vcmask 64512   ;;  %p1808_p0 = scmp.ne.s32.totalorder %s1315_s2, %s1807_s25  ;;  %s1916_s21 = smov [#allocation15]  }
  0x77   : > { %v609_v37 = vsel %vm360_vm1, %v556_v36, 0  ;;  %v449_v46 = vunpack.c.0.s8 %v448_v44  ;;  %539 = vst.msk [vmem:[#allocation4] sm:$0xff] %vm536_vm4, %v1908_v0  ;;  %540 = vst.msk [vmem:[#allocation4 + $0x8] sm:$0xff] %vm536_vm4, %v1908_v0  ;;  %vm1060_vm6 = vcmask 1043456   ;;  %s1811_s0 = sshll.u32 %s1916_s21, 4  ;;  %s1812_s0 = int_to_ptr.vmem [resolvable:$false] %s1811_s0 }
  0x78   : > { %p1809_p3 = pnand %p1808_p0, %p2043_p5  ;;  %s1813_s10 = scalar_lea.vmem %s1812_s0, 256 }
  0x79   : > { %v2154_v50 = vsub.s32 %v449_v46, %v420_v42  ;;  %p1814_p11 = scmp.lt.s32.totalorder %s1315_s2, %s1812_s0  ;;  %p1815_p9 = scmp.lt.s32.totalorder %s1813_s10, %s1807_s25 }
  0x7a   : > { %p1810_p10 = pneg %p1809_p3 }
  0x7b   : > { %1506 = vmatpush3.bf16.xpose.msra.mxu0 %v365_v15  ;;  %p1816_p13 = por %p1815_p9, %p1814_p11 }
  0x7c   : > { %1514 = vmatpush3.bf16.xpose.msra.mxu1 %v563_v16  ;;  %1519 = vmatprep.subr.bf16.mxu0 %v1908_v0 }
  0x7d   : > { %1527 = vmatprep.subr.bf16.mxu1 %v1908_v0  ;;  %p1817_p2 = pnand %p1816_p13, %p1810_p10 }
  0x82   : > { %1508 = vmatmul.mubr.msk.bf16.vlgmr.msra.gmra.mxu0 %vm360_vm1, %v353_v19 }
  0x83   : > { %1516 = vmatmul.mubr.msk.bf16.vlgmr.msra.gmra.mxu1 %vm360_vm1, %v545_v20  ;;  %1523 = vmatprep.mubr.msk.bf16.mxu0 %vm1909_vm0, %v1908_v0 }
  0x84   : > { %1529 = vmatprep.mubr.msk.bf16.mxu1 %vm1909_vm0, %v1908_v0  ;;  %1520 = vmatpush3.bf16.xpose.msra.mxu0 %v612_v35 }
  0x85   : > { %1521 = vmatprep.subr.bf16.mxu0 %v1908_v0 }
  0x8c   : > { %1522 = vmatpush3.bf16.xpose.msra.mxu0 %v609_v37 }
  0x8d   : > { %1539 = vmatprep.subr.bf16.mxu0 %v1908_v0 }
  0x93   : > { %1524 = vmatmul.mubr.msk.bf16.vlgmr.msra.gmra.mxu0 %vm360_vm1, %v545_v20 }
  0x94   : > { %1541 = vmatprep.mubr.msk.bf16.mxu0 %vm1909_vm0, %v1908_v0 }
 0x142   : > { %v404_v21 = vpop.f32.mrf.mxu0 }
 0x143   : > { %v410_v22 = vmul.f32 0.25, %v404_v21  ;;  %v602_v23 = vpop.f32.mrf.mxu1 }
 0x144   : > { %v1509_v24 = vpop.f32.mrf.mxu0  ;;  %v658_v57 = vcombine.high %v602_v23, %v1908_v0  ;;  %v665_v63 = vrot.slane %v602_v23, %v2150_v45 }
 0x145   : > { %v1517_v25 = vpop.f32.mrf.mxu1  ;;  %412 = vrot.lane.b32.xlu0 %v410_v22, %s1910_s24  ;;  %v415_v47 = vcombine.high %v410_v22, %v1908_v0  ;;  %v422_v49 = vrot.slane %v410_v22, %v2150_v45 }
 0x146   : > { %v407_v26 = vpop.f32.mrf.mxu0  ;;  %v672_v7 = vrot.slane %v658_v57, %v2150_v45 }
 0x147   : > { %v605_v27 = vpop.f32.mrf.mxu1  ;;  %v429_v53 = vrot.slane %v415_v47, %v2150_v45 }
 0x148   : > { %v1510_v28 = vpop.f32.mrf.mxu0 }
 0x149   : > { %v1518_v29 = vpop.f32.mrf.mxu1  ;;  %655 = vrot.lane.b32.xlu0 %v602_v23, %s1910_s24 }
 0x1b7   : > { %v413_v48 = vpop.permute.xlu0 %412 }
 0x1b8   : > { %v430_v51 = vcombine.high %v413_v48, %v1908_v0  ;;  %v437_v52 = vrot.slane %v413_v48, %v2150_v45 }
 0x1ba   : > { %v444_v54 = vrot.slane %v430_v51, %v2150_v45  ;;  %v445_v55 = vcombine.low %v422_v49, %v437_v52  ;;  %v446_v56 = vcombine.high %v422_v49, %v437_v52 }
 0x1bb   : > { %v656_v58 = vpop.permute.xlu0 %655 }
 0x1bc   : > { %v453_v59 = vrot.slane %v445_v55, %v2154_v50  ;;  %v460_v60 = vrot.slane %v446_v56, %v2154_v50  ;;  %v461_v61 = vcombine.low %v429_v53, %v444_v54  ;;  %v462_v62 = vcombine.high %v429_v53, %v444_v54 }
 0x1bd   : > { %v673_v1 = vcombine.high %v656_v58, %v1908_v0  ;;  %v680_v2 = vrot.slane %v656_v58, %v2150_v45  ;;  %v1913_v53 = vmov -inf  }
 0x1be   : > { %v469_v3 = vrot.slane %v461_v61, %v2154_v50  ;;  %v476_v4 = vrot.slane %v462_v62, %v2154_v50  ;;  %v481_v5 = vcombine.low %v453_v59, %v460_v60  ;;  %v1468_v6 = vcombine.high %v453_v59, %v460_v60  ;;  %537 = vst.msk [vmem:[#allocation3] sm:$0xff] %vm536_vm4, %v1913_v53 }
 0x1bf   : > { %v687_v8 = vrot.slane %v673_v1, %v2150_v45  ;;  %v688_v9 = vcombine.low %v665_v63, %v680_v2  ;;  %v689_v10 = vcombine.high %v665_v63, %v680_v2  ;;  %538 = vst.msk [vmem:[#allocation3 + $0x8] sm:$0xff] %vm536_vm4, %v1913_v53  ;;  %v1914_v63 = vmov 0   ;;  %v648_v2 = vpop.f32.mrf.mxu0 }
 0x1c0   : > { %v488_v11 = vrot.slane %v481_v5, %v2150_v45  ;;  %v496_v12 = vrot.slane %v1468_v6, %v2150_v45  ;;  %v497_v13 = vcombine.low %v469_v3, %v476_v4  ;;  %v1469_v14 = vcombine.high %v469_v3, %v476_v4  ;;  %1659 = vset.pattern.permute.xlu0 %v1914_v63 }
 0x1c1   : > { %v696_v15 = vrot.slane %v688_v9, %v2154_v50  ;;  %v703_v16 = vrot.slane %v689_v10, %v2154_v50  ;;  %v704_v17 = vcombine.low %v672_v7, %v687_v8  ;;  %v705_v18 = vcombine.high %v672_v7, %v687_v8  ;;  %1660 = vset.pattern.permute.xlu1 %v1914_v63  ;;  %v1525_v3 = vpop.f32.mrf.mxu0 }
 0x1c2   : > { %v504_v19 = vrot.slane %v497_v13, %v2150_v45  ;;  %v512_v20 = vrot.slane %v1469_v14, %v2150_v45  ;;  %v513_v21 = vcombine.low %v488_v11, %v496_v12 }
 0x1c3   : > { %v712_v22 = vrot.slane %v704_v17, %v2154_v50  ;;  %v719_v23 = vrot.slane %v705_v18, %v2154_v50  ;;  %v724_v24 = vcombine.low %v696_v15, %v703_v16  ;;  %v1472_v25 = vcombine.high %v696_v15, %v703_v16  ;;  %v651_v4 = vpop.f32.mrf.mxu0 }
 0x1c4   : > { %v521_v26 = vcombine.low %v504_v19, %v512_v20  ;;  %v520_v31 = vrot.slane %v513_v21, %v2154_v50  ;;  %v780_v16 = vcombine.high %v648_v2, %v1908_v0  ;;  %v787_v19 = vrot.slane %v648_v2, %v2150_v45 }
 0x1c5   : > { %v731_v27 = vrot.slane %v724_v24, %v2150_v45  ;;  %v739_v28 = vrot.slane %v1472_v25, %v2150_v45  ;;  %v740_v29 = vcombine.low %v712_v22, %v719_v23  ;;  %v1473_v30 = vcombine.high %v712_v22, %v719_v23  ;;  %v1526_v5 = vpop.f32.mrf.mxu0  ;;  %v993_v6 = vld [vmem:[#allocation3] sm:$0xff] }
 0x1c6   : > { %v528_v32 = vrot.slane %v521_v26, %v2154_v50  ;;  %v994_v10 = vld [vmem:[#allocation3 + $0x8] sm:$0xff]  ;;  %v794_v22 = vrot.slane %v780_v16, %v2150_v45 }
 0x1c7   : > { %v747_v33 = vrot.slane %v740_v29, %v2150_v45  ;;  %v755_v34 = vrot.slane %v1473_v30, %v2150_v45  ;;  %v756_v35 = vcombine.low %v731_v27, %v739_v28  ;;  %v1042_v16 = vld [vmem:[#allocation5 + $0x8] sm:$0xff] }
 0x1c8   : > { %v529_v36 = vcombine.low %v520_v31, %v528_v32  ;;  %v530_v37 = vcombine.high %v520_v31, %v528_v32 }
 0x1c9   : > { %v764_v38 = vcombine.low %v747_v33, %v755_v34  ;;  %v763_v41 = vrot.slane %v756_v35, %v2154_v50 }
 0x1ca   : > { %v531_v39 = vpack.c.bf16 %v529_v36, %v529_v36  ;;  %v532_v40 = vpack.c.bf16 %v530_v37, %v530_v37 }
 0x1cb   : > { %v771_v42 = vrot.slane %v764_v38, %v2154_v50 }
 0x1cc   : > { %534 = vst.msk [vmem:[#allocation2] sm:$0xf] %vm533_vm3, %v531_v39  ;;  %535 = vst.msk [vmem:[#allocation2 + $0x4] sm:$0xf] %vm533_vm3, %v532_v40 }
 0x1cd   : > { %v772_v43 = vcombine.low %v763_v41, %v771_v42  ;;  %v773_v47 = vcombine.high %v763_v41, %v771_v42 }
 0x1cf   : > { %v774_v44 = vpack.c.bf16 %v772_v43, %v772_v43  ;;  %v775_v48 = vpack.c.bf16 %v773_v47, %v773_v47 }
 0x1d1   : > { %v905_v46 = vsel %vm541_vm2, %v774_v44, 0  ;;  %v951_v51 = vsel %vm541_vm2, %v775_v48, 0 }
 0x1d2   : > { %1528 = vmatpush3.bf16.xpose.msra.mxu1 %v905_v46 }
 0x1d3   : > { %1533 = vmatprep.subr.bf16.mxu1 %v1908_v0  ;;  %v898_v49 = vld [vmem:[#allocation2] sm:$0xf]  ;;  %v899_v52 = vld [vmem:[#allocation2 + $0x4] sm:$0xf] }
 0x1d9   : > { %1530 = vmatmul.mubr.msk.bf16.vlgmr.msra.gmra.mxu1 %vm541_vm2, %v898_v49 }
 0x1da   : > { %1534 = vmatpush3.bf16.xpose.msra.mxu1 %v951_v51  ;;  %1535 = vmatprep.mubr.msk.bf16.mxu1 %vm1909_vm0, %v1908_v0 }
 0x1db   : > { %1545 = vmatprep.subr.bf16.mxu1 %v1908_v0 }
 0x1e1   : > { %1536 = vmatmul.mubr.msk.bf16.vlgmr.msra.gmra.mxu1 %vm541_vm2, %v899_v52 }
 0x1e2   : > { %1547 = vmatprep.mubr.msk.bf16.mxu1 %vm1909_vm0, %v1908_v0 }
 0x299   : > { %v941_v54 = vpop.f32.mrf.mxu1 }
 0x29a   : > { %v996_v55 = vsel %vm995_vm5, %v941_v54, -inf }
 0x29b   : > { %997 = vmax.xlane.f32.xlu1 %v996_v55  ;;  %v1531_v56 = vpop.f32.mrf.mxu1 }
 0x29d   : > { %v944_v57 = vpop.f32.mrf.mxu1 }
 0x29f   : > { %v1532_v58 = vpop.f32.mrf.mxu1 }
 0x2a1   : > { %v987_v59 = vpop.f32.mrf.mxu1 }
 0x2a2   : > { %v999_v60 = vsel %vm995_vm5, %v987_v59, -inf }
 0x2a3   : > { %1000 = vmax.xlane.f32.xlu1 %v999_v60  ;;  %v1537_v61 = vpop.f32.mrf.mxu1 }
 0x2a5   : > { %v990_v62 = vpop.f32.mrf.mxu1 }
 0x2a7   : > { %v1538_v1 = vpop.f32.mrf.mxu1 }
 0x324   : > { %v998_v7 = vpop.xlane.xlu1 %997 }
 0x325   : > { %v1002_v8 = vmax.f32 %v993_v6, %v998_v7 }
 0x327   : > { %v1004_v9 = vsub.f32 %v993_v6, %v1002_v8  ;;  %1154 = vst.msk [vmem:[#allocation3] sm:$0xff] %vm536_vm4, %v1002_v8  ;;  %1012 = vperm.xlu0 %1659, %v1002_v8   ;;  %v1027_v6 = vld [vmem:[#allocation4 + $0x8] sm:$0xff] }
 0x329   : > { %v1006_v55 = vmul.f32 1.442695, %v1004_v9 }
 0x32b   : > { %777 = vrot.lane.b32.xlu0 %v648_v2, %s1910_s24  ;;  %v1026_v2 = vld [vmem:[#allocation4] sm:$0xff] }
 0x32c   : > { %v1001_v11 = vpop.xlane.xlu1 %1000 }
 0x32d   : > { %v1003_v12 = vmax.f32 %v994_v10, %v1001_v11 }
 0x32f   : > { %v1005_v13 = vsub.f32 %v994_v10, %v1003_v12  ;;  %1155 = vst.msk [vmem:[#allocation3 + $0x8] sm:$0xff] %vm536_vm4, %v1003_v12  ;;  %1017 = vperm.xlu1 %1660, %v1003_v12  }
 0x331   : > { %v1008_v60 = vmul.f32 1.442695, %v1005_v13 }
 0x3a2   : > { %v1013_v14 = vpop.permute.xlu0 %1012 }
 0x3a3   : > { %v1020_v15 = vsub.f32 %v941_v54, %v1013_v14  ;;  %v1041_v14 = vld [vmem:[#allocation5] sm:$0xff] }
 0x3a5   : > { %v1022_v17 = vmul.f32 1.442695, %v1020_v15 }
 0x3a6   : > { %v778_v18 = vpop.permute.xlu0 %777 }
 0x3a7   : > { %1661 = vpow2.f32 %v1022_v17  ;;  %v795_v20 = vcombine.high %v778_v18, %v1908_v0  ;;  %v802_v21 = vrot.slane %v778_v18, %v2150_v45 }
 0x3a9   : > { %v809_v23 = vrot.slane %v795_v20, %v2150_v45  ;;  %v810_v24 = vcombine.low %v787_v19, %v802_v21  ;;  %v811_v25 = vcombine.high %v787_v19, %v802_v21 }
 0x3aa   : > { %v1018_v26 = vpop.permute.xlu1 %1017 }
 0x3ab   : > { %v818_v27 = vrot.slane %v810_v24, %v2154_v50  ;;  %v825_v28 = vrot.slane %v811_v25, %v2154_v50  ;;  %v826_v29 = vcombine.low %v794_v22, %v809_v23  ;;  %v827_v30 = vcombine.high %v794_v22, %v809_v23 }
 0x3ac   : > { %v1021_v31 = vsub.f32 %v987_v59, %v1018_v26 }
 0x3ad   : > { %v834_v32 = vrot.slane %v826_v29, %v2154_v50  ;;  %v841_v33 = vrot.slane %v827_v30, %v2154_v50  ;;  %v846_v34 = vcombine.low %v818_v27, %v825_v28  ;;  %v1474_v35 = vcombine.high %v818_v27, %v825_v28 }
 0x3ae   : > { %v1024_v36 = vmul.f32 1.442695, %v1021_v31 }
 0x3af   : > { %v853_v37 = vrot.slane %v846_v34, %v2150_v45  ;;  %v861_v38 = vrot.slane %v1474_v35, %v2150_v45  ;;  %v862_v39 = vcombine.low %v834_v32, %v841_v33  ;;  %v1475_v40 = vcombine.high %v834_v32, %v841_v33 }
 0x3b0   : > { %1663 = vpow2.f32 %v1024_v36 }
 0x3b1   : > { %v869_v41 = vrot.slane %v862_v39, %v2150_v45  ;;  %v877_v42 = vrot.slane %v1475_v40, %v2150_v45  ;;  %v878_v43 = vcombine.low %v853_v37, %v861_v38  ;;  %1665 = vpow2.f32 %v1006_v55 }
 0x3b2   : > { %1667 = vpow2.f32 %v1008_v60 }
 0x3b3   : > { %v886_v44 = vcombine.low %v869_v41, %v877_v42  ;;  %v885_v48 = vrot.slane %v878_v43, %v2154_v50 }
 0x3b4   : > { %v1662_v46 = vpop.eup %1661 }
 0x3b5   : > { %v1030_v47 = vsel %vm995_vm5, %v1662_v46, 0.0  ;;  %v893_v49 = vrot.slane %v886_v44, %v2154_v50  ;;  %v1055_v59 = vpack.c.bf16 %v1662_v46, %v1662_v46 }
 0x3b6   : > { %1031 = vadd.xlane.f32.xlu0 %v1030_v47 }
 0x3b7   : > { %v894_v51 = vcombine.low %v885_v48, %v893_v49  ;;  %v895_v52 = vcombine.high %v885_v48, %v893_v49 }
 0x3b9   : > { %v896_v53 = vpack.c.bf16 %v894_v51, %v894_v51  ;;  %v897_v54 = vpack.c.bf16 %v895_v52, %v895_v52 }
 0x3bb   : > { %v1062_v56 = vsel %vm1060_vm6, %v896_v53, 0  ;;  %v1108_v57 = vsel %vm1060_vm6, %v897_v54, 0 }
 0x3bc   : > { %1540 = vmatpush3.bf16.msra.mxu0 %v1062_v56  ;;  %1546 = vmatpush3.bf16.msra.mxu1 %v1108_v57 }
 0x3bd   : > { %v1664_v58 = vpop.eup %1663 }
 0x3be   : > { %v1033_v61 = vsel %vm995_vm5, %v1664_v58, 0.0  ;;  %v1056_v62 = vpack.c.bf16 %v1664_v58, %v1664_v58  ;;  %v1666_v63 = vpop.eup %1665 }
 0x3bf   : > { %1034 = vadd.xlane.f32.xlu1 %v1033_v61  ;;  %1542 = vmatmul.mubr.msk.bf16.vlgmr.msra.gmra.mxu0 %vm995_vm5, %v1055_v59  ;;  %v1668_v1 = vpop.eup %1667  ;;  %v1028_v3 = vmul.f32 %v1666_v63, %v1026_v2 }
 0x3c0   : > { %1548 = vmatmul.mubr.msk.bf16.vlgmr.msra.gmra.mxu1 %vm995_vm5, %v1056_v62  ;;  %v1029_v7 = vmul.f32 %v1668_v1, %v1027_v6 }
 0x3cc   : > { %1045 = vperm.xlu0 %1659, %v1666_v63  }
 0x3d0   : > { %1050 = vperm.xlu1 %1660, %v1668_v1  }
 0x43f   : > { %v1032_v4 = vpop.xlane.xlu0 %1031 }
 0x440   : > { %v1036_v5 = vadd.f32 %v1032_v4, %v1028_v3 }
 0x442   : > { %1039 = vst.msk [vmem:[#allocation4] sm:$0xff] %vm536_vm4, %v1036_v5 }
 0x447   : > { %v1046_v15 = vpop.permute.xlu0 %1045 }
 0x448   : > { %v1035_v8 = vpop.xlane.xlu1 %1034  ;;  %v1053_v18 = vmul.f32 %v1046_v15, %v1041_v14 }
 0x449   : > { %v1037_v9 = vadd.f32 %v1035_v8, %v1029_v7  ;;  %v1161_v10 = vld [vmem:[#allocation4] sm:$0xff] }
 0x44a   : > { %1669 = vrcp.f32 %v1161_v10 }
 0x44b   : > { %1040 = vst.msk [vmem:[#allocation4 + $0x8] sm:$0xff] %vm536_vm4, %v1037_v9 }
 0x44c   : > { %v1051_v17 = vpop.permute.xlu1 %1050 }
 0x44d   : > { %v1054_v19 = vmul.f32 %v1051_v17, %v1042_v16 }
 0x452   : > { %v1162_v11 = vld [vmem:[#allocation4 + $0x8] sm:$0xff] }
 0x453   : > { %1671 = vrcp.f32 %v1162_v11 }
 0x457   : > { %v1670_v12 = vpop.eup %1669 }
 0x458   : > { %1167 = vperm.xlu0 %1659, %v1670_v12  }
 0x460   : > { %v1672_v13 = vpop.eup %1671 }
 0x461   : > { %1172 = vperm.xlu0 %1659, %v1672_v13  }
 0x47f   : > { %v1098_v20 = vpop.f32.mrf.mxu0 }
 0x480   : > { %v1150_v21 = vadd.f32 %v1098_v20, %v1053_v18  ;;  %v1144_v22 = vpop.f32.mrf.mxu1 }
 0x481   : > { %v1151_v23 = vadd.f32 %v1144_v22, %v1054_v19  ;;  %v1543_v24 = vpop.f32.mrf.mxu0 }
 0x482   : > { %1152 = vst.msk [vmem:[#allocation5] sm:$0xff] %vm541_vm2, %v1150_v21  ;;  %v1549_v25 = vpop.f32.mrf.mxu1 }
 0x483   : > { %1153 = vst.msk [vmem:[#allocation5 + $0x8] sm:$0xff] %vm541_vm2, %v1151_v23  ;;  %v1101_v26 = vpop.f32.mrf.mxu0 }
 0x484   : > { %v1147_v27 = vpop.f32.mrf.mxu1 }
 0x485   : > { %v1544_v28 = vpop.f32.mrf.mxu0 }
 0x486   : > { %v1550_v29 = vpop.f32.mrf.mxu1 }
 0x489   : > { %v1159_v31 = vld [vmem:[#allocation5] sm:$0xff] }
 0x48a   : > { %v1160_v34 = vld [vmem:[#allocation5 + $0x8] sm:$0xff] }
 0x4d3   : > { %v1168_v30 = vpop.permute.xlu0 %1167 }
 0x4d4   : > { %v1175_v32 = vmul.f32 %v1168_v30, %v1159_v31 }
 0x4d6   : > { %v1177_v35 = vcombine.high %v1175_v32, %v1908_v0  ;;  %v1184_v37 = vrot.slane %v1175_v32, %v2150_v45 }
 0x4d8   : > { %v1191_v40 = vrot.slane %v1177_v35, %v2150_v45 }
 0x4dc   : > { %v1173_v33 = vpop.permute.xlu0 %1172 }
 0x4dd   : > { %v1176_v36 = vmul.f32 %v1173_v33, %v1160_v34 }
 0x4df   : > { %v1192_v38 = vcombine.high %v1176_v36, %v1908_v0  ;;  %v1199_v39 = vrot.slane %v1176_v36, %v2150_v45 }
 0x4e1   : > { %v1206_v41 = vrot.slane %v1192_v38, %v2150_v45  ;;  %v1207_v42 = vcombine.low %v1184_v37, %v1199_v39  ;;  %v1208_v43 = vcombine.high %v1184_v37, %v1199_v39 }
 0x4e3   : > { %v1215_v44 = vrot.slane %v1207_v42, %v2154_v50  ;;  %v1222_v46 = vrot.slane %v1208_v43, %v2154_v50  ;;  %v1223_v47 = vcombine.low %v1191_v40, %v1206_v41  ;;  %v1224_v48 = vcombine.high %v1191_v40, %v1206_v41 }
 0x4e5   : > { %v1231_v49 = vrot.slane %v1223_v47, %v2154_v50  ;;  %v1238_v51 = vrot.slane %v1224_v48, %v2154_v50  ;;  %v1243_v52 = vcombine.low %v1215_v44, %v1222_v46  ;;  %v1480_v0 = vcombine.high %v1215_v44, %v1222_v46 }
 0x4e7   : > { %v1259_v53 = vcombine.low %v1231_v49, %v1238_v51  ;;  %v1481_v54 = vcombine.high %v1231_v49, %v1238_v51  ;;  %v1250_v55 = vrot.slane %v1243_v52, %v2150_v45  ;;  %v1258_v56 = vrot.slane %v1480_v0, %v2150_v45 }
 0x4e9   : > { %v1266_v57 = vrot.slane %v1259_v53, %v2150_v45  ;;  %v1274_v58 = vrot.slane %v1481_v54, %v2150_v45  ;;  %v1275_v59 = vcombine.low %v1250_v55, %v1258_v56 }
 0x4eb   : > { %v1283_v60 = vcombine.low %v1266_v57, %v1274_v58  ;;  %v1282_v61 = vrot.slane %v1275_v59, %v2154_v50 }
 0x4ed   : > { %v1290_v62 = vrot.slane %v1283_v60, %v2154_v50 }
 0x4ef   : > { %v1292_v63 = vcombine.high %v1282_v61, %v1290_v62  ;;  %v1291_v1 = vcombine.low %v1282_v61, %v1290_v62 }
 0x4f1   : > { %1294 = vrot.lane.b32.xlu1 %v1292_v63, %s1915_s26 }
 0x563   : > { %v1295_v2 = vpop.permute.xlu1 %1294 }
 0x564   : > { %v1297_v45 = vsel %vm541_vm2, %v1291_v1, %v1295_v2 }
 0x565   : > { %1298 = vst.msk [vmem:[%s346_s15] sm:$0xff] %vm360_vm1, %v1297_v45 }
 0x566   : > { %1820 = shalt.err (!%p1817_p2)
}
 0x567   : > { %s1821_s17 = scalar_lea.hbm %s2252_s7, 128  ;;  %s1825_s28 = scalar_lea.hbm %s2301_s5, 256 }
 0x568   : > { %p1822_p4 = scmp.ne.s32.totalorder %s2252_s7, %s1821_s17  ;;  %p1826_p7 = scmp.lt.s32.totalorder %s2252_s7, %s2301_s5 }
 0x569   : > { %p1827_p6 = scmp.lt.s32.totalorder %s1825_s28, %s1821_s17 }
 0x56a   : > { %p1823_p1 = pnand %p1822_p4, %p2043_p5 }
 0x56b   : > { %p1828_p12 = por %p1827_p6, %p1826_p7 }
 0x56c   : > { %p1824_p8 = pneg %p1823_p1 }
 0x56e   : > { %p1829_p0 = pnand %p1828_p12, %p1824_p8 }
 0x570   : > { %1832 = shalt.err (!%p1829_p0)
}
 0x571   : > { %1567 = dma.vmem_to_hbm [thread:$0]  (%p2043_p5), %s1315_s2, 128, %s2252_s7, %s1300_s16  }
 0x572 PF: > { %s1326_s24 = sand.u32 1, %s1879_s18   ;;  %p2322_p3 = scmp.ne.s32.totalorder %s2308_s27, 0 }
 0x573   : > { %p2323_p10 = scmp.ge.s32.totalorder %s1899_s23, 2  ;;  %s1327_s26 = scalar_lea.sflag [#allocation8], %s1326_s24 }
 0x575   : > { %p1587_p11 = pnand %p2323_p10, %p2322_p3 }
 0x577   : > { %p1588_p9 = pneg %p1587_p11 }
 0x579   : > { %1874 = dma.done.wait (%p1588_p9), %s1327_s26, 128  }
 0x57a   : > { %1876 = vsyncadd (%p1588_p9), %s1327_s26, 4294967168  ;;  %s25_s23 = sadd.s32 1, %s1899_s23   ;;  %s2324_s18 = smov %s1883_s19 }
 0x57b   : > { %p22_p13 = scmp.ge.s32.totalorder %s25_s23, 4   ;;  %s2325_s19 = smov %s1887_s20 }
 0x57c   : > { %s2326_s20 = smov %s2055_s13  ;;  %s2327_s21 = smov %s1895_s22 }
 0x57d   : > { %s2328_s22 = smov %s2330_s9  ;;  %24 = sbr.rel (!%p22_p13) target bundleno = 13 (0xd), region = 118 }
 0x582   :  { %1332 = vsyncpa [#allocation7], 1 }
 0x583   :  { %1334 = vsyncpa [#allocation7 + $0x1], 1 }
 0x584   :  { %1335 = vsyncpa [#allocation10], 1 }
 0x585   :  { %1337 = vsyncpa [#allocation10 + $0x1], 1 }
 0x586   :  { %1338 = vsyncpa [#allocation13], 1 }
 0x587   :  { %1339 = vsyncpa [#allocation8], 1 }
 0x588   :  { %1341 = vsyncpa [#allocation8 + $0x1], 1 }

</bundles_post_ra>
